<compile_context>
chip_gen: v7x
topology: tpu7x:2x2x1
jax: 0.10.0
libtpu: 0.0.40
codegen_flags: <defaults>
</compile_context>

<pallas_src>
from functools import partial

import jax
import jax.numpy as jnp
from jax.experimental import pallas as pl
from jax.experimental.pallas import tpu as pltpu


_MIB = 1024 * 1024
_TUNING_CACHE = None


# ---------------------------------------------------------------------------
# Generation / dtype aware tuning helpers
# ---------------------------------------------------------------------------

def _round_up(x, m):
    return -(-x // m) * m


def _round_down(x, m):
    return (x // m) * m


def _sublane_unit(dtype):
    """Packed sublane tile height: 8 for f32, 16 for bf16, 32 for int8/fp8."""
    return max(8, 32 // int(jnp.dtype(dtype).itemsize))


def _tpu_tuning():
    """(block_bytes, lane_target, vmem_limit, fused_vmem_limit) for this TPU.

    v5e : ~0.82 TB/s HBM, 128 MiB VMEM -> ~2 MiB blocks already near roofline.
    v6e : ~1.4  TB/s HBM, 128 MiB VMEM -> ~4 MiB blocks.
    v7x : ~3.2  TB/s HBM,  64 MiB VMEM -> ~8 MiB blocks, capped VMEM limit.
    """
    global _TUNING_CACHE
    if _TUNING_CACHE is not None:
        return _TUNING_CACHE

    kind = ""
    try:
        kind = jax.devices()[0].device_kind.lower()
    except Exception:
        pass
    vmem_phys = 128 * _MIB
    try:
        info = pltpu.get_tpu_info()
        vmem_phys = int(getattr(info, "vmem_capacity_bytes", vmem_phys))
    except Exception:
        pass

    if ("v5 lite" in kind) or ("v5e" in kind) or ("v5lite" in kind):
        cfg = (2 * _MIB, 2048, 32 * _MIB, 64 * _MIB)
    elif ("v7" in kind) or (vmem_phys <= 80 * _MIB):
        # v7x-class: only 64 MiB physical VMEM per TC -> keep limit <= 48 MiB.
        cfg = (8 * _MIB, 8192, 48 * _MIB, 48 * _MIB)
    else:  # v6e / v5p / unknown default
        cfg = (4 * _MIB, 4096, 32 * _MIB, 64 * _MIB)

    _TUNING_CACHE = cfg
    return cfg


def _select_tiles(R, HW, itemsize, unit, block_bytes, lane_target,
                  force_lane_tile=None):
    """Pick (TR, TL, grid) from a byte budget.  Blocks are multiples of the
    packed (unit, 128) tile or full-extent; ragged dims use a cdiv grid."""
    # --- lane (H*W) tile ---
    if force_lane_tile is not None:
        TL = int(force_lane_tile)
    elif HW <= lane_target:
        TL = HW                                  # full extent: always legal
    else:
        TL = max(128, _round_down(lane_target, 128))
    grid_hw = pl.cdiv(HW, TL)

    # --- row (N*C) tile from the byte budget ---
    row_budget = max(1, block_bytes // max(1, TL * itemsize))
    TR = _round_down(min(row_budget, R), unit)
    if TR == 0:
        TR = R if R <= unit else unit
    TR = min(TR, R)
    # Phase 1 only shards over the row axis (HW is the reduction axis), so
    # keep >=2 row tiles when legal so megacore (v7x: 2 TCs) uses both cores.
    if TR == R and R >= 2 * unit:
        TR = min(R, _round_up(-(-R // 2), unit))
    grid_rows = pl.cdiv(R, TR)
    return TR, TL, (grid_rows, grid_hw)


# ---------------------------------------------------------------------------
# Kernels
# ---------------------------------------------------------------------------

def _fused_train_kernel(x_ref, w_ref, b_ref, rm_ref, rv_ref,
                        y_ref, mbn_ref, vbn_ref,
                        *, hw, eps, momentum, use_running):
    """Single-pass training path: x resident in VMEM -> stats + normalize."""
    x = x_ref[...].astype(jnp.float32)                        # (N, C, HW)
    s = jnp.sum(x, axis=-1, keepdims=True)                    # (N, C, 1)
    ss = jnp.sum(x * x, axis=-1, keepdims=True)               # (N, C, 1)

    mean_in = s * (1.0 / hw)
    var_in = (ss - s * mean_in) * (1.0 / max(hw - 1, 1))      # unbiased (ddof=1)
    temp = var_in + mean_in * mean_in

    inv_n = 1.0 / x.shape[0]
    mean_bn = jnp.sum(mean_in, axis=0, keepdims=True) * inv_n          # (1, C, 1)
    var_bn = jnp.sum(temp, axis=0, keepdims=True) * inv_n - mean_bn * mean_bn
    var_bn = jnp.maximum(var_bn, 0.0)                         # guard cancellation
    mbn_ref[...] = mean_bn
    vbn_ref[...] = var_bn

    if use_running:                                           # static branch
        mean_use = rm_ref[...] * momentum + (1.0 - momentum) * mean_bn
        var_use = rv_ref[...] * momentum + (1.0 - momentum) * var_bn
    else:
        mean_use, var_use = mean_bn, var_bn

    inv_std = jax.lax.rsqrt(var_use + eps)                    # (1, C, 1)
    scale = w_ref[...] * inv_std
    shift = b_ref[...] - mean_use * scale
    y_ref[...] = (x * scale + shift).astype(y_ref.dtype)


def _stats_kernel(x_ref, sum_ref, sumsq_ref, *, hw, lane_tile, need_mask):
    """Phase 1: per-row (= per (n, c) instance) sum and sum-of-squares.

    HW grid axis is the reduction axis; partials accumulate in resident output
    blocks.  A ragged last lane tile is zero-masked (need_mask is static)."""
    x = x_ref[...].astype(jnp.float32)                        # (TR, TL)
    if need_mask:
        lane = jax.lax.broadcasted_iota(jnp.int32, x.shape, dimension=1)
        valid = (pl.program_id(1) * lane_tile + lane) < hw
        x = jnp.where(valid, x, 0.0)

    @pl.when(pl.program_id(1) == 0)
    def _init():
        sum_ref[...] = jnp.zeros_like(sum_ref)
        sumsq_ref[...] = jnp.zeros_like(sumsq_ref)

    sum_ref[...] += jnp.sum(x, axis=-1, keepdims=True)        # (TR, 1)
    sumsq_ref[...] += jnp.sum(x * x, axis=-1, keepdims=True)  # (TR, 1)


def _norm_kernel(x_ref, scale_ref, shift_ref, y_ref):
    """Phase 2: y = x * scale + shift with per-row folded scale/shift."""
    y = x_ref[...].astype(jnp.float32) * scale_ref[...] + shift_ref[...]
    y_ref[...] = y.astype(y_ref.dtype)


# ---------------------------------------------------------------------------
# Forward wrapper
# ---------------------------------------------------------------------------

def batch_norm_mod_2d(x, weight, bias, running_mean, running_var,
                      eps=1e-5, momentum=0.99, training=True,
                      use_running_stats_in_training=False,
                      _force_two_phase=False, _force_lane_tile=None):
    """Forward of BatchNormMod2d.

    Returns (y, new_running_mean, new_running_var)."""
    N, C, H, W = x.shape
    HW = H * W
    R = N * C
    itemsize = int(jnp.dtype(x.dtype).itemsize)
    unit = _sublane_unit(x.dtype)
    block_bytes, lane_target, vmem_limit, fused_vmem_limit = _tpu_tuning()

    # -------- fused single-pass fast path (training, x fits in VMEM) --------
    c_pad = _round_up(C, unit)
    hw_pad = _round_up(HW, 128)
    fused_est = N * c_pad * hw_pad * (2 * itemsize + 2 * 4)   # x + y + f32 temps
    if (training and not _force_two_phase
            and fused_est <= int(0.55 * fused_vmem_limit)):
        x3 = x.reshape(N, C, HW)
        w3 = jnp.asarray(weight, jnp.float32).reshape(1, C, 1)
        b3 = jnp.asarray(bias, jnp.float32).reshape(1, C, 1)
        rm3 = jnp.asarray(running_mean, jnp.float32).reshape(1, C, 1)
        rv3 = jnp.asarray(running_var, jnp.float32).reshape(1, C, 1)

        y3, mbn, vbn = pl.pallas_call(
            partial(_fused_train_kernel, hw=HW, eps=float(eps),
                    momentum=float(momentum),
                    use_running=bool(use_running_stats_in_training)),
            out_shape=(jax.ShapeDtypeStruct((N, C, HW), x.dtype),
                       jax.ShapeDtypeStruct((1, C, 1), jnp.float32),
                       jax.ShapeDtypeStruct((1, C, 1), jnp.float32)),
            compiler_params=pltpu.CompilerParams(
                vmem_limit_bytes=fused_vmem_limit),
            cost_estimate=pl.CostEstimate(
                flops=int(7 * N * C * HW), transcendentals=int(C),
                bytes_accessed=int(2 * N * C * HW * itemsize)),
        )(x3, w3, b3, rm3, rv3)

        mean_bn = mbn.reshape(C)
        var_bn = vbn.reshape(C)
        new_rm = (running_mean * momentum
                  + (1.0 - momentum) * mean_bn.reshape(running_mean.shape))
        new_rv = (running_var * momentum
                  + (1.0 - momentum) * var_bn.reshape(running_var.shape))
        return y3.reshape(N, C, H, W), new_rm, new_rv

    # ------------------------- general two-phase path -----------------------
    x2 = x.reshape(R, HW)
    TR, TL, grid = _select_tiles(R, HW, itemsize, unit, block_bytes,
                                 lane_target, _force_lane_tile)

    new_rm, new_rv = running_mean, running_var
    if training:
        need_mask = (HW % TL) != 0
        sum_x, sum_xx = pl.pallas_call(
            partial(_stats_kernel, hw=HW, lane_tile=TL, need_mask=need_mask),
            out_shape=(jax.ShapeDtypeStruct((R, 1), jnp.float32),
                       jax.ShapeDtypeStruct((R, 1), jnp.float32)),
            grid=grid,
            in_specs=[pl.BlockSpec((TR, TL), lambda i, j: (i, j))],
            out_specs=(pl.BlockSpec((TR, 1), lambda i, j: (i, 0)),
                       pl.BlockSpec((TR, 1), lambda i, j: (i, 0))),
            compiler_params=pltpu.CompilerParams(
                dimension_semantics=("parallel", "arbitrary"),
                vmem_limit_bytes=vmem_limit),
            cost_estimate=pl.CostEstimate(
                flops=int(3 * R * HW), transcendentals=0,
                bytes_accessed=int(R * HW * itemsize + 2 * R * 4)),
        )(x2)

        # ---- tiny (N, C) batch-statistics math in plain JAX ----
        s = sum_x.reshape(N, C)
        ss = sum_xx.reshape(N, C)
        mean_in = s / HW                                      # (N, C)
        var_in = (ss - s * mean_in) / max(HW - 1, 1)          # unbiased (ddof=1)
        temp = var_in + mean_in * mean_in
        mean_bn = jnp.mean(mean_in, axis=0)                   # (C,)
        var_bn = jnp.mean(temp, axis=0) - mean_bn * mean_bn
        var_bn = jnp.maximum(var_bn, 0.0)

        new_rm = (running_mean * momentum
                  + (1.0 - momentum) * mean_bn.reshape(running_mean.shape))
        new_rv = (running_var * momentum
                  + (1.0 - momentum) * var_bn.reshape(running_var.shape))

        if use_running_stats_in_training:
            mean_use = new_rm.reshape(C).astype(jnp.float32)
            var_use = new_rv.reshape(C).astype(jnp.float32)
        else:
            mean_use, var_use = mean_bn, var_bn
    else:
        mean_use = jnp.asarray(running_mean, jnp.float32).reshape(C)
        var_use = jnp.asarray(running_var, jnp.float32).reshape(C)

    # ---- fold normalization + affine into per-row scale / shift ----
    inv_std = jax.lax.rsqrt(var_use + eps)
    scale_c = jnp.asarray(weight, jnp.float32).reshape(C) * inv_std
    shift_c = jnp.asarray(bias, jnp.float32).reshape(C) - mean_use * scale_c
    scale_r = jnp.broadcast_to(scale_c, (N, C)).reshape(R, 1)
    shift_r = jnp.broadcast_to(shift_c, (N, C)).reshape(R, 1)

    # ---- phase 2: tiled normalize + affine (fully parallel grid) ----
    y2 = pl.pallas_call(
        _norm_kernel,
        out_shape=jax.ShapeDtypeStruct((R, HW), x.dtype),
        grid=grid,
        in_specs=[pl.BlockSpec((TR, TL), lambda i, j: (i, j)),
                  pl.BlockSpec((TR, 1), lambda i, j: (i, 0)),
                  pl.BlockSpec((TR, 1), lambda i, j: (i, 0))],
        out_specs=pl.BlockSpec((TR, TL), lambda i, j: (i, j)),
        compiler_params=pltpu.CompilerParams(
            dimension_semantics=("parallel", "parallel"),
            vmem_limit_bytes=vmem_limit),
        cost_estimate=pl.CostEstimate(
            flops=int(2 * R * HW), transcendentals=0,
            bytes_accessed=int(2 * R * HW * itemsize + 2 * R * 4)),
    )(x2, scale_r, shift_r)

    return y2.reshape(N, C, H, W), new_rm, new_rv


# ---------------------------------------------------------------------------
# Pure-JAX reference (mirrors the PyTorch forward)
# ---------------------------------------------------------------------------

def _reference_forward(x, weight, bias, running_mean, running_var,
                       eps=1e-5, momentum=0.99, training=True,
                       use_running_stats_in_training=False):
    N, C, H, W = x.shape
    xv = x.reshape(N, C, -1).astype(jnp.float32)
    mean_in = xv.mean(-1, keepdims=True)
    var_in = xv.var(-1, ddof=1, keepdims=True)               # torch.var unbiased
    temp = var_in + mean_in ** 2
    rm, rv = running_mean, running_var
    if training:
        mean_bn = mean_in.mean(0, keepdims=True)
        var_bn = temp.mean(0, keepdims=True) - mean_bn ** 2
        rm = running_mean * momentum + (1.0 - momentum) * mean_bn
        rv = running_var * momentum + (1.0 - momentum) * var_bn
        if use_running_stats_in_training:
            mean_bn, var_bn = rm, rv
    else:
        mean_bn, var_bn = running_mean, running_var
    y = (xv - mean_bn) / jnp.sqrt(var_bn + eps)
    y = y.reshape(N, C, H, W) * weight + bias
    return y, rm, rv


if __name__ == "__main__":
    N, C, H, W = 2, 4, 16, 16
    kx, kw, kb = jax.random.split(jax.random.PRNGKey(0), 3)

    x = jax.random.normal(kx, (N, C, H, W), dtype=jnp.float32) * 2.0 + 0.5
    weight = 1.0 + 0.1 * jax.random.normal(kw, (1, C, 1, 1), dtype=jnp.float32)
    bias = 0.1 * jax.random.normal(kb, (1, C, 1, 1), dtype=jnp.float32)
    running_mean = jnp.zeros((1, C, 1), dtype=jnp.float32)
    running_var = jnp.zeros((1, C, 1), dtype=jnp.float32)

    # 1) training / batch-statistics path (fused single-pass kernel)
    y, new_rm, new_rv = batch_norm_mod_2d(
        x, weight, bias, running_mean, running_var, training=True)
    jax.block_until_ready((y, new_rm, new_rv))
    y_ref, rm_ref, rv_ref = _reference_forward(
        x, weight, bias, running_mean, running_var, training=True)
    assert y.shape == (N, C, H, W)
    assert jnp.allclose(y, y_ref, atol=1e-4, rtol=1e-4), "train-mode y mismatch"
    assert jnp.allclose(new_rm, rm_ref, atol=1e-5, rtol=1e-4), "running_mean mismatch"
    assert jnp.allclose(new_rv, rv_ref, atol=1e-5, rtol=1e-4), "running_var mismatch"

    # 2) eval path (normalize with running buffers; phase-2 kernel only)
    y_eval, _, _ = batch_norm_mod_2d(
        x, weight, bias, new_rm, new_rv, training=False)
    jax.block_until_ready(y_eval)
    y_eval_ref, _, _ = _reference_forward(
        x, weight, bias, new_rm, new_rv, training=False)
    assert jnp.allclose(y_eval, y_eval_ref, atol=1e-4, rtol=1e-4), "eval-mode y mismatch"

    # 3) training with use_running_stats_in_training (fused kernel branch)
    y_u, rm_u, rv_u = batch_norm_mod_2d(
        x, weight, bias, running_mean, running_var, training=True,
        use_running_stats_in_training=True)
    jax.block_until_ready((y_u, rm_u, rv_u))
    y_u_ref, rm_u_ref, rv_u_ref = _reference_forward(
        x, weight, bias, running_mean, running_var, training=True,
        use_running_stats_in_training=True)
    assert jnp.allclose(y_u, y_u_ref, atol=1e-3, rtol=1e-4), "use-running y mismatch"
    assert jnp.allclose(rm_u, rm_u_ref, atol=1e-5, rtol=1e-4)
    assert jnp.allclose(rv_u, rv_u_ref, atol=1e-5, rtol=1e-4)

    # 4) two-phase path forced, ragged H*W (not a multiple of 128) -> cdiv+mask
    Hr, Wr = 12, 13                                   # HW = 156
    xr = jax.random.normal(jax.random.PRNGKey(1), (N, C, Hr, Wr), jnp.float32)
    yr, rmr, rvr = batch_norm_mod_2d(
        xr, weight, bias, running_mean, running_var, training=True,
        _force_two_phase=True, _force_lane_tile=128)
    jax.block_until_ready((yr, rmr, rvr))
    yr_ref, rmr_ref, rvr_ref = _reference_forward(
        xr, weight, bias, running_mean, running_var, training=True)
    assert jnp.allclose(yr, yr_ref, atol=1e-4, rtol=1e-4), "ragged-HW y mismatch"
    assert jnp.allclose(rmr, rmr_ref, atol=1e-5, rtol=1e-4)
    assert jnp.allclose(rvr, rvr_ref, atol=1e-5, rtol=1e-4)

    # 5) two-phase path, bf16 activations (dtype-aware 16-sublane packing)
    xb = x.astype(jnp.bfloat16)
    yb, rmb, rvb = batch_norm_mod_2d(
        xb, weight, bias, running_mean, running_var, training=True,
        _force_two_phase=True)
    jax.block_until_ready((yb, rmb, rvb))
    yb_ref, rmb_ref, rvb_ref = _reference_forward(
        xb.astype(jnp.float32), weight, bias, running_mean, running_var,
        training=True)
    assert jnp.allclose(yb.astype(jnp.float32), yb_ref, atol=5e-2, rtol=5e-2)
    assert jnp.allclose(rmb, rmb_ref, atol=1e-2, rtol=1e-2)
    assert jnp.allclose(rvb, rvb_ref, atol=1e-2, rtol=1e-2)

    print("KERNEL_OK")
</pallas_src>

<mosaic_0001>
module attributes {stable_mosaic.version = 11 : i64} {
  func.func @_fused_train_kernel(%arg0: memref<2x4x256xf32, #tpu.memory_space<vmem>>, %arg1: memref<1x4x1xf32, #tpu.memory_space<vmem>>, %arg2: memref<1x4x1xf32, #tpu.memory_space<vmem>>, %arg3: memref<1x4x1xf32, #tpu.memory_space<vmem>>, %arg4: memref<1x4x1xf32, #tpu.memory_space<vmem>>, %arg5: memref<2x4x256xf32, #tpu.memory_space<vmem>>, %arg6: memref<1x4x1xf32, #tpu.memory_space<vmem>>, %arg7: memref<1x4x1xf32, #tpu.memory_space<vmem>>) attributes {dimension_semantics = [], scalar_prefetch = 0 : i64, scratch_operands = 0 : i64, tpu.core_type = #tpu.core_type<tc>} {
    %c0 = arith.constant 0 : index
    %c0_0 = arith.constant 0 : index
    %c0_1 = arith.constant 0 : index
    %0 = vector.load %arg0[%c0, %c0_0, %c0_1] : memref<2x4x256xf32, #tpu.memory_space<vmem>>, vector<2x4x256xf32>
    %cst = arith.constant dense<0.000000e+00> : vector<2x4xf32>
    %1 = vector.multi_reduction <add>, %0, %cst [2] : vector<2x4x256xf32> to vector<2x4xf32>
    %2 = vector.shape_cast %1 : vector<2x4xf32> to vector<2x4x1xf32>
    %3 = arith.mulf %0, %0 : vector<2x4x256xf32>
    %cst_2 = arith.constant dense<0.000000e+00> : vector<2x4xf32>
    %4 = vector.multi_reduction <add>, %3, %cst_2 [2] : vector<2x4x256xf32> to vector<2x4xf32>
    %5 = vector.shape_cast %4 : vector<2x4xf32> to vector<2x4x1xf32>
    %cst_3 = arith.constant 3.906250e-03 : f32
    %6 = vector.broadcast %cst_3 : f32 to vector<2x4x1xf32>
    %7 = arith.mulf %2, %6 : vector<2x4x1xf32>
    %8 = arith.mulf %2, %7 : vector<2x4x1xf32>
    %9 = arith.subf %5, %8 : vector<2x4x1xf32>
    %cst_4 = arith.constant 0.00392156886 : f32
    %10 = vector.broadcast %cst_4 : f32 to vector<2x4x1xf32>
    %11 = arith.mulf %9, %10 : vector<2x4x1xf32>
    %12 = arith.mulf %7, %7 : vector<2x4x1xf32>
    %13 = arith.addf %11, %12 : vector<2x4x1xf32>
    %cst_5 = arith.constant dense<0.000000e+00> : vector<4x1xf32>
    %14 = vector.multi_reduction <add>, %7, %cst_5 [0] : vector<2x4x1xf32> to vector<4x1xf32>
    %15 = vector.shape_cast %14 : vector<4x1xf32> to vector<1x4x1xf32>
    %cst_6 = arith.constant 5.000000e-01 : f32
    %16 = vector.broadcast %cst_6 : f32 to vector<1x4x1xf32>
    %17 = arith.mulf %15, %16 : vector<1x4x1xf32>
    %cst_7 = arith.constant dense<0.000000e+00> : vector<4x1xf32>
    %18 = vector.multi_reduction <add>, %13, %cst_7 [0] : vector<2x4x1xf32> to vector<4x1xf32>
    %19 = vector.shape_cast %18 : vector<4x1xf32> to vector<1x4x1xf32>
    %cst_8 = arith.constant 5.000000e-01 : f32
    %20 = vector.broadcast %cst_8 : f32 to vector<1x4x1xf32>
    %21 = arith.mulf %19, %20 : vector<1x4x1xf32>
    %22 = arith.mulf %17, %17 : vector<1x4x1xf32>
    %23 = arith.subf %21, %22 : vector<1x4x1xf32>
    %cst_9 = arith.constant 0.000000e+00 : f32
    %24 = vector.broadcast %cst_9 : f32 to vector<1x4x1xf32>
    %25 = arith.maximumf %23, %24 : vector<1x4x1xf32>
    %c0_10 = arith.constant 0 : index
    %c0_11 = arith.constant 0 : index
    %c0_12 = arith.constant 0 : index
    %26 = vector.load %arg6[%c0_10, %c0_11, %c0_12] : memref<1x4x1xf32, #tpu.memory_space<vmem>>, vector<1x4x1xf32>
    tpu.vector_store %arg6[%c0_10, %c0_11, %c0_12], %17 {strides = array<i32>} : memref<1x4x1xf32, #tpu.memory_space<vmem>>, vector<1x4x1xf32>,
    %c0_13 = arith.constant 0 : index
    %c0_14 = arith.constant 0 : index
    %c0_15 = arith.constant 0 : index
    %27 = vector.load %arg7[%c0_13, %c0_14, %c0_15] : memref<1x4x1xf32, #tpu.memory_space<vmem>>, vector<1x4x1xf32>
    tpu.vector_store %arg7[%c0_13, %c0_14, %c0_15], %25 {strides = array<i32>} : memref<1x4x1xf32, #tpu.memory_space<vmem>>, vector<1x4x1xf32>,
    %cst_16 = arith.constant 9.99999974E-6 : f32
    %28 = vector.broadcast %cst_16 : f32 to vector<1x4x1xf32>
    %29 = arith.addf %25, %28 : vector<1x4x1xf32>
    %30 = math.rsqrt %29 : vector<1x4x1xf32>
    %c0_17 = arith.constant 0 : index
    %c0_18 = arith.constant 0 : index
    %c0_19 = arith.constant 0 : index
    %31 = vector.load %arg1[%c0_17, %c0_18, %c0_19] : memref<1x4x1xf32, #tpu.memory_space<vmem>>, vector<1x4x1xf32>
    %32 = arith.mulf %31, %30 : vector<1x4x1xf32>
    %c0_20 = arith.constant 0 : index
    %c0_21 = arith.constant 0 : index
    %c0_22 = arith.constant 0 : index
    %33 = vector.load %arg2[%c0_20, %c0_21, %c0_22] : memref<1x4x1xf32, #tpu.memory_space<vmem>>, vector<1x4x1xf32>
    %34 = arith.mulf %17, %32 : vector<1x4x1xf32>
    %35 = arith.subf %33, %34 : vector<1x4x1xf32>
    %36 = vector.broadcast %32 : vector<1x4x1xf32> to vector<2x4x256xf32>
    %37 = arith.mulf %0, %36 : vector<2x4x256xf32>
    %38 = vector.broadcast %35 : vector<1x4x1xf32> to vector<2x4x256xf32>
    %39 = arith.addf %37, %38 : vector<2x4x256xf32>
    %c0_23 = arith.constant 0 : index
    %c0_24 = arith.constant 0 : index
    %c0_25 = arith.constant 0 : index
    %40 = vector.load %arg5[%c0_23, %c0_24, %c0_25] : memref<2x4x256xf32, #tpu.memory_space<vmem>>, vector<2x4x256xf32>
    tpu.vector_store %arg5[%c0_23, %c0_24, %c0_25], %39 {strides = array<i32>} : memref<2x4x256xf32, #tpu.memory_space<vmem>>, vector<2x4x256xf32>,
    return
  }
}

</mosaic_0001>

<bundles_post_ra>
// kernel: tpu_custom_call.1
= control target key start
LH: loop header
LB: loop body
LE: loop exit
PB: predicated region body
PF: predicated region fallthrough
CT: control target
= control target key end

     0   :  { %13 = vsyncpa [#allocation3], 0  ;;  %s617_s0 = inlined_call_operand.hbm [shape: f32[2,4,256], index: 0, kind: input, shape index: {}]   ;;  %s618_s1 = inlined_call_operand.hbm [shape: f32[1,4,1], index: 1, kind: input, shape index: {}]   ;;  %s619_s2 = inlined_call_operand.hbm [shape: f32[1,4,1], index: 2, kind: input, shape index: {}]   ;;  %s620_s3 = inlined_call_operand.hbm [shape: f32[1,4,1], index: 3, kind: input, shape index: {}]   ;;  %s621_s4 = inlined_call_operand.hbm [shape: f32[1,4,1], index: 4, kind: input, shape index: {}]   ;;  %s622_s5 = inlined_call_operand.hbm [shape: f32[2,4,256], index: 5, kind: output, shape index: {0}]   ;;  %s623_s6 = inlined_call_operand.hbm [shape: f32[1,4,1], index: 6, kind: output, shape index: {1}]   ;;  %s624_s7 = inlined_call_operand.hbm [shape: f32[1,4,1], index: 7, kind: output, shape index: {2}]  }
   0x1   :  { %14 = vsyncpa [#allocation6], 0 }
   0x2   :  { %15 = vsyncpa [#allocation9], 0 }
   0x3   :  { %16 = vsyncpa [#allocation4], 0 }
   0x4   :  { %17 = vsyncpa [#allocation13], 0  ;;  %s435_s24 = smov [#allocation5]   ;;  %s436_s26 = smov [#allocation8]  }
   0x5   :  { %s36_s25 = sshll.u32 %s435_s24, 4  ;;  %s56_s27 = sshll.u32 %s436_s26, 4  ;;  %s37_s25 = int_to_ptr.vmem [resolvable:$true] %s36_s25  ;;  %s57_s27 = int_to_ptr.vmem [resolvable:$true] %s56_s27 }
   0x6   :  { %s249_s30 = scalar_lea.hbm %s618_s1, 64 }
   0x7   :  { %p250_p0 = scmp.ne.s32.totalorder %s618_s1, %s249_s30  ;;  %p253_p1 = scmp.lt.u32.totalorder %s249_s30, %s618_s1 }
   0x9   :  { %p255_p2 = pnand %p253_p1, %p250_p0 }
   0xb   :  { %258 = shalt.err (!%p255_p2)
}
   0xc   :  { %s259_s12 = scalar_lea.vmem %s37_s25, 64  ;;  %p264_p4 = scmp.lt.s32.totalorder %s37_s25, %s37_s25 }
   0xd   :  { %p260_p3 = scmp.ne.s32.totalorder %s37_s25, %s259_s12  ;;  %p265_p5 = scmp.lt.s32.totalorder %s259_s12, %s259_s12 }
   0xf   :  { %p266_p6 = por %p265_p5, %p264_p4 }
  0x11   :  { %p267_p7 = pnand %p266_p6, %p260_p3 }
  0x13   :  { %270 = shalt.err (!%p267_p7)
}
  0x14   :  { %39 = dma.hbm_to_vmem [thread:$0]  %s618_s1, 64, %s37_s25, [#allocation6]  }
  0x15   :  { %s271_s17 = scalar_lea.hbm %s620_s3, 64 }
  0x16   :  { %p272_p8 = scmp.ne.s32.totalorder %s620_s3, %s271_s17  ;;  %p275_p9 = scmp.lt.u32.totalorder %s271_s17, %s620_s3 }
  0x18   :  { %p277_p10 = pnand %p275_p9, %p272_p8 }
  0x1a   :  { %280 = shalt.err (!%p277_p10)
}
  0x1b   :  { %s281_s22 = scalar_lea.vmem %s57_s27, 64  ;;  %p286_p12 = scmp.lt.s32.totalorder %s57_s27, %s57_s27 }
  0x1c   :  { %p282_p11 = scmp.ne.s32.totalorder %s57_s27, %s281_s22  ;;  %p287_p13 = scmp.lt.s32.totalorder %s281_s22, %s281_s22 }
  0x1e   :  { %p288_p0 = por %p287_p13, %p286_p12 }
  0x20   :  { %p289_p1 = pnand %p288_p0, %p282_p11 }
  0x22   :  { %292 = shalt.err (!%p289_p1)
}
  0x23   :  { %59 = dma.hbm_to_vmem [thread:$0]  %s620_s3, 64, %s57_s27, [#allocation9]  }
  0x24   :  { %s437_s24 = smov [#allocation2]   ;;  %s293_s29 = scalar_lea.hbm %s617_s0, 256 }
  0x25   :  { %s23_s25 = sshll.u32 %s437_s24, 4  ;;  %p294_p2 = scmp.ne.s32.totalorder %s617_s0, %s293_s29  ;;  %s24_s25 = int_to_ptr.vmem [resolvable:$true] %s23_s25 }
  0x26   :  { %p297_p3 = scmp.lt.u32.totalorder %s293_s29, %s617_s0 }
  0x28   :  { %p299_p4 = pnand %p297_p3, %p294_p2 }
  0x2a   :  { %302 = shalt.err (!%p299_p4)
}
  0x2b   :  { %s303_s11 = scalar_lea.vmem %s24_s25, 256  ;;  %p308_p6 = scmp.lt.s32.totalorder %s24_s25, %s24_s25 }
  0x2c   :  { %p304_p5 = scmp.ne.s32.totalorder %s24_s25, %s303_s11  ;;  %p309_p7 = scmp.lt.s32.totalorder %s303_s11, %s303_s11 }
  0x2e   :  { %p310_p8 = por %p309_p7, %p308_p6 }
  0x30   :  { %p311_p9 = pnand %p310_p8, %p304_p5 }
  0x32   :  { %314 = shalt.err (!%p311_p9)
}
  0x33   :  { %s438_s3 = smov 128   ;;  %s439_s27 = smov 8  }
  0x34   :  { %29 = dma.hbm_to_vmem [thread:$0]  %s617_s0, 256, %s24_s25, [#allocation3], %s438_s3, %s438_s3, %s439_s27  }
  0x35   :  { %s440_s14 = smov [#allocation7]   ;;  %s441_s16 = smov [#allocation10]  }
  0x36   :  { %s46_s15 = sshll.u32 %s440_s14, 4  ;;  %s66_s17 = sshll.u32 %s441_s16, 4  ;;  %s47_s15 = int_to_ptr.vmem [resolvable:$true] %s46_s15  ;;  %s67_s17 = int_to_ptr.vmem [resolvable:$true] %s66_s17 }
  0x37   :  { %s315_s20 = scalar_lea.hbm %s619_s2, 64 }
  0x38   :  { %p316_p10 = scmp.ne.s32.totalorder %s619_s2, %s315_s20  ;;  %p319_p11 = scmp.lt.u32.totalorder %s315_s20, %s619_s2 }
  0x3a   :  { %p321_p12 = pnand %p319_p11, %p316_p10 }
  0x3c   :  { %324 = shalt.err (!%p321_p12)
}
  0x3d   :  { %s325_s0 = scalar_lea.vmem %s47_s15, 64  ;;  %p330_p0 = scmp.lt.s32.totalorder %s47_s15, %s47_s15 }
  0x3e   :  { %p326_p13 = scmp.ne.s32.totalorder %s47_s15, %s325_s0  ;;  %p331_p1 = scmp.lt.s32.totalorder %s325_s0, %s325_s0 }
  0x40   :  { %p332_p2 = por %p331_p1, %p330_p0 }
  0x42   :  { %p333_p3 = pnand %p332_p2, %p326_p13 }
  0x44   :  { %336 = shalt.err (!%p333_p3)
}
  0x45   :  { %49 = dma.hbm_to_vmem [thread:$0]  %s619_s2, 64, %s47_s15, [#allocation6]  }
  0x46   :  { %s337_s29 = scalar_lea.hbm %s621_s4, 64 }
  0x47   :  { %p338_p4 = scmp.ne.s32.totalorder %s621_s4, %s337_s29  ;;  %p341_p5 = scmp.lt.u32.totalorder %s337_s29, %s621_s4 }
  0x49   :  { %p343_p6 = pnand %p341_p5, %p338_p4 }
  0x4b   :  { %346 = shalt.err (!%p343_p6)
}
  0x4c   :  { %s347_s11 = scalar_lea.vmem %s67_s17, 64  ;;  %p352_p8 = scmp.lt.s32.totalorder %s67_s17, %s67_s17 }
  0x4d   :  { %p348_p7 = scmp.ne.s32.totalorder %s67_s17, %s347_s11  ;;  %p353_p9 = scmp.lt.s32.totalorder %s347_s11, %s347_s11 }
  0x4f   :  { %p354_p10 = por %p353_p9, %p352_p8 }
  0x51   :  { %p355_p11 = pnand %p354_p10, %p348_p7 }
  0x53   :  { %358 = shalt.err (!%p355_p11)
}
  0x54   :  { %69 = dma.hbm_to_vmem [thread:$0]  %s621_s4, 64, %s67_s17, [#allocation9]  }
  0x55   :  { %425 = dma.done.wait [#allocation3], 256  }
  0x56   :  { %426 = vsyncadd [#allocation3], 4294967040 }
  0x57   :  { %427 = dma.done.wait [#allocation6], 128  }
  0x58   :  { %428 = vsyncadd [#allocation6], 4294967168 }
  0x59   :  { %429 = dma.done.wait [#allocation9], 128  }
  0x5a   :  { %430 = vsyncadd [#allocation9], 4294967168  ;;  %vm93_vm0 = vcmask 1043456   ;;  %v550_v0 = vld [vmem:[#allocation2] sm:$0xff]  ;;  %v552_v1 = vld [vmem:[#allocation2 + $0x8] sm:$0xff]  ;;  %v442_v20 = vmov 0  }
  0x5b   :  { %v89_v2 = vcombine.high %v550_v0, %v550_v0  ;;  %v94_v3 = vsel %vm93_vm0, %v550_v0, 0.0  ;;  %v104_v4 = vmul.f32 %v550_v0, %v550_v0  ;;  %v90_v5 = vcombine.high %v552_v1, %v552_v1  ;;  %243 = vset.pattern.permute.xlu0 %v442_v20  ;;  %244 = vset.pattern.permute.xlu1 %v442_v20  ;;  %v150_v49 = vld [vmem:[#allocation5] sm:$0xf]  ;;  %v152_v52 = vld [vmem:[#allocation7] sm:$0xf]  ;;  %s443_s4 = smov [#allocation12]  }
  0x5c   :  { %v99_v6 = vsel %vm93_vm0, %v552_v1, 0.0  ;;  %v105_v7 = vmul.f32 %v552_v1, %v552_v1  ;;  %vm145_vm1 = vcmask 3072   ;;  %s203_s13 = sshll.u32 %s443_s4, 4  ;;  %s204_s13 = int_to_ptr.vmem [resolvable:$true] %s203_s13 }
  0x5d   :  { %v95_v8 = vsel %vm93_vm0, %v89_v2, 0.0  ;;  %v108_v9 = vcombine.high %v104_v4, %v104_v4  ;;  %v112_v10 = vsel %vm93_vm0, %v104_v4, 0.0  ;;  %v100_v11 = vsel %vm93_vm0, %v90_v5, 0.0  ;;  %s359_s14 = scalar_lea.vmem %s204_s13, 64  ;;  %p364_p13 = scmp.lt.s32.totalorder %s204_s13, %s204_s13 }
  0x5e   :  { %v96_v12 = vadd.f32 %v95_v8, %v94_v3  ;;  %v109_v13 = vcombine.high %v105_v7, %v105_v7  ;;  %v117_v15 = vsel %vm93_vm0, %v105_v7, 0.0  ;;  %v101_v17 = vadd.f32 %v100_v11, %v99_v6  ;;  %p360_p12 = scmp.ne.s32.totalorder %s204_s13, %s359_s14  ;;  %p365_p0 = scmp.lt.s32.totalorder %s359_s14, %s359_s14 }
  0x5f   :  { %v113_v14 = vsel %vm93_vm0, %v108_v9, 0.0 }
  0x60   :  { %97 = vadd.xlane.f32.xlu0 %v96_v12  ;;  %v114_v16 = vadd.f32 %v113_v14, %v112_v10  ;;  %v118_v18 = vsel %vm93_vm0, %v109_v13, 0.0  ;;  %p366_p1 = por %p365_p0, %p364_p13 }
  0x61   :  { %v119_v19 = vadd.f32 %v118_v18, %v117_v15 }
  0x62   :  { %115 = vadd.xlane.f32.xlu1 %v114_v16  ;;  %p367_p2 = pnand %p366_p1, %p360_p12 }
  0x64   :  { %102 = vadd.xlane.f32.xlu0 %v101_v17 }
  0x66   :  { %120 = vadd.xlane.f32.xlu1 %v119_v19 }
  0xed   :  { %v98_v21 = vpop.xlane.xlu0 %97 }
  0xee   :  { %v122_v22 = vmul.f32 0.00390625, %v98_v21 }
  0xef   :  { %v116_v23 = vpop.xlane.xlu1 %115 }
  0xf0   :  { %v124_v24 = vmul.f32 %v122_v22, %v98_v21  ;;  %v134_v29 = vsel %vm93_vm0, %v122_v22, 0.0  ;;  %v130_v34 = vmul.f32 %v122_v22, %v122_v22 }
  0xf1   :  { %v103_v25 = vpop.xlane.xlu0 %102 }
  0xf2   :  { %v126_v26 = vsub.f32 %v116_v23, %v124_v24  ;;  %v123_v27 = vmul.f32 0.00390625, %v103_v25 }
  0xf3   :  { %v121_v28 = vpop.xlane.xlu1 %120 }
  0xf4   :  { %v128_v30 = vmul.f32 0.003921569, %v126_v26  ;;  %v125_v31 = vmul.f32 %v123_v27, %v103_v25  ;;  %v135_v32 = vsel %vm93_vm0, %v123_v27, 0.0  ;;  %v131_v39 = vmul.f32 %v123_v27, %v123_v27 }
  0xf5   :  { %v136_v33 = vadd.f32 %v135_v32, %v134_v29 }
  0xf6   :  { %v127_v35 = vsub.f32 %v121_v28, %v125_v31  ;;  %v132_v37 = vadd.f32 %v130_v34, %v128_v30 }
  0xf7   :  { %v137_v36 = vmul.f32 0.5, %v136_v33 }
  0xf8   :  { %v129_v38 = vmul.f32 0.003921569, %v127_v35  ;;  %v138_v41 = vsel %vm93_vm0, %v132_v37, 0.0 }
  0xf9   :  { %146 = vst.msk [vmem:[#allocation12] sm:$0xf] %vm145_vm1, %v137_v36  ;;  %v142_v45 = vmul.f32 %v137_v36, %v137_v36 }
  0xfa   :  { %v133_v40 = vadd.f32 %v131_v39, %v129_v38 }
  0xfc   :  { %v139_v42 = vsel %vm93_vm0, %v133_v40, 0.0 }
  0xfd   :  { %v140_v43 = vadd.f32 %v139_v42, %v138_v41 }
  0xff   :  { %v141_v44 = vmul.f32 0.5, %v140_v43 }
 0x101   :  { %v143_v46 = vsub.f32 %v141_v44, %v142_v45 }
 0x103   :  { %v144_v47 = vmax.f32 %v143_v46, 0.0 }
 0x105   :  { %v148_v48 = vadd.f32 1e-05, %v144_v47  ;;  %147 = vst.msk [vmem:[#allocation14] sm:$0xf] %vm145_vm1, %v144_v47 }
 0x107   :  { %247 = vrsqrt.f32 %v148_v48 }
 0x111   :  { %v248_v50 = vpop.eup %247 }
 0x112   :  { %v151_v51 = vmul.f32 %v248_v50, %v150_v49 }
 0x114   :  { %157 = vperm.xlu0 %243, %v151_v51   ;;  %v153_v53 = vmul.f32 %v151_v51, %v137_v36 }
 0x116   :  { %v154_v54 = vsub.f32 %v152_v52, %v153_v53 }
 0x118   :  { %171 = vperm.xlu1 %244, %v154_v54  }
 0x119   :  { %370 = shalt.err (!%p367_p2)
}
 0x11a   :  { %s371_s17 = scalar_lea.hbm %s623_s6, 64 }
 0x11b   :  { %p372_p3 = scmp.ne.s32.totalorder %s623_s6, %s371_s17  ;;  %p375_p4 = scmp.lt.u32.totalorder %s371_s17, %s623_s6 }
 0x11d   :  { %p377_p5 = pnand %p375_p4, %p372_p3 }
 0x11f   :  { %380 = shalt.err (!%p377_p5)
}
 0x120   :  { %206 = dma.vmem_to_hbm [thread:$0]  %s204_s13, 64, %s623_s6, [#allocation13]  }
 0x121   :  { %s444_s23 = smov [#allocation14]  }
 0x122   :  { %s213_s0 = sshll.u32 %s444_s23, 4  ;;  %s214_s0 = int_to_ptr.vmem [resolvable:$true] %s213_s0 }
 0x123   :  { %s381_s24 = scalar_lea.vmem %s214_s0, 64  ;;  %p386_p7 = scmp.lt.s32.totalorder %s214_s0, %s214_s0 }
 0x124   :  { %p382_p6 = scmp.ne.s32.totalorder %s214_s0, %s381_s24  ;;  %p387_p8 = scmp.lt.s32.totalorder %s381_s24, %s381_s24 }
 0x126   :  { %p388_p9 = por %p387_p8, %p386_p7 }
 0x128   :  { %p389_p10 = pnand %p388_p9, %p382_p6 }
 0x12a   :  { %392 = shalt.err (!%p389_p10)
}
 0x12b   :  { %s393_s28 = scalar_lea.hbm %s624_s7, 64 }
 0x12c   :  { %p394_p11 = scmp.ne.s32.totalorder %s624_s7, %s393_s28  ;;  %p397_p12 = scmp.lt.u32.totalorder %s393_s28, %s624_s7 }
 0x12e   :  { %p399_p13 = pnand %p397_p12, %p394_p11 }
 0x130   :  { %402 = shalt.err (!%p399_p13)
}
 0x131   :  { %216 = dma.vmem_to_hbm [thread:$0]  %s214_s0, 64, %s624_s7, [#allocation13]   ;;  %v445_v55 = vmov 839922192   ;;  %v162_v57 = vlaneseq }
 0x132   :  { %v160_v56 = vunpack.c.l.s4 %v445_v55  ;;  %s446_s11 = smov [#allocation11]  }
 0x133   :  { %v163_v59 = vshrl.u32 %v162_v57, 7  ;;  %s190_s2 = sshll.u32 %s446_s11, 4  ;;  %s191_s2 = int_to_ptr.vmem [resolvable:$true] %s190_s2 }
 0x134   :  { %v161_v58 = vunpack.c.0.s8 %v160_v56  ;;  %s403_s7 = scalar_lea.vmem %s191_s2, 256  ;;  %p408_p1 = scmp.lt.s32.totalorder %s191_s2, %s191_s2 }
 0x135   :  { %p404_p0 = scmp.ne.s32.totalorder %s191_s2, %s403_s7  ;;  %p409_p2 = scmp.lt.s32.totalorder %s403_s7, %s403_s7 }
 0x136   :  { %v164_v60 = vsub.s32 %v161_v58, %v163_v59 }
 0x137   :  { %p410_p3 = por %p409_p2, %p408_p1 }
 0x139   :  { %p411_p4 = pnand %p410_p3, %p404_p0 }
 0x193   :  { %v158_v61 = vpop.permute.xlu0 %157 }
 0x194   :  { %v165_v62 = vrot.slane %v158_v61, %v164_v60 }
 0x196   :  { %v167_v2 = vmul.f32 %v165_v62, %v550_v0  ;;  %v168_v3 = vmul.f32 %v165_v62, %v552_v1 }
 0x197   :  { %v172_v63 = vpop.permute.xlu1 %171 }
 0x198   :  { %v179_v4 = vrot.slane %v172_v63, %v164_v60 }
 0x19a   :  { %v181_v5 = vadd.f32 %v179_v4, %v167_v2  ;;  %v182_v6 = vadd.f32 %v179_v4, %v168_v3 }
 0x19c   :  { %183 = vst [vmem:[#allocation11] sm:$0xff] %v181_v5  ;;  %184 = vst [vmem:[#allocation11 + $0x8] sm:$0xff] %v182_v6 }
 0x19d   :  { %414 = shalt.err (!%p411_p4)
}
 0x19e   :  { %s415_s13 = scalar_lea.hbm %s622_s5, 256 }
 0x19f   :  { %p416_p5 = scmp.ne.s32.totalorder %s622_s5, %s415_s13  ;;  %p419_p6 = scmp.lt.u32.totalorder %s415_s13, %s622_s5 }
 0x1a1   :  { %p421_p7 = pnand %p419_p6, %p416_p5 }
 0x1a3   :  { %424 = shalt.err (!%p421_p7)
}
 0x1a4   :  { %196 = dma.vmem_to_hbm [thread:$0]  %s191_s2, 256, %s622_s5, [#allocation4], %s438_s3, %s438_s3, %s439_s27  }
 0x1a5   :  { %431 = dma.done.wait [#allocation4], 256  }
 0x1a6   :  { %432 = vsyncadd [#allocation4], 4294967040 }
 0x1a7   :  { %433 = dma.done.wait [#allocation13], 128  }
 0x1a8   :  { %434 = vsyncadd [#allocation13], 4294967168 }
 0x1a9   :  { %226 = vsyncpa [#allocation3], 1 }
 0x1aa   :  { %227 = vsyncpa [#allocation6], 1 }
 0x1ab   :  { %228 = vsyncpa [#allocation9], 1 }
 0x1ac   :  { %229 = vsyncpa [#allocation4], 1 }
 0x1ad   :  { %230 = vsyncpa [#allocation13], 1 }

</bundles_post_ra>
